<compile_context>
chip_gen: v7x
topology: tpu7x:2x2x1
jax: 0.10.0
libtpu: 0.0.40
codegen_flags: <defaults>
</compile_context>

<pallas_src>
import functools

import jax
import jax.numpy as jnp
from jax.experimental import pallas as pl
from jax.experimental.pallas import tpu as pltpu


def _round_up(x: int, m: int) -> int:
    return ((x + m - 1) // m) * m


def _silu(x):
    return x * jax.nn.sigmoid(x)


def mlp_kernel(x_ref, w1_ref, b1_ref, w2_ref, b2_ref, w3_ref, b3_ref, o_ref):
    # x tile: (dim_in, TILE_B)  -- batch on the lane axis, already f32.
    x = x_ref[...]

    # Layer 1: Linear(dim_in, hidden) + SiLU   (norm=False -> Identity)
    h = jnp.dot(w1_ref[...], x, preferred_element_type=jnp.float32) + b1_ref[...]
    h = _silu(h)

    # Layer 2: Linear(hidden, hidden) + SiLU
    h = jnp.dot(w2_ref[...], h, preferred_element_type=jnp.float32) + b2_ref[...]
    h = _silu(h)

    # Output layer: Linear(hidden, dim_out)
    o_ref[...] = (
        jnp.dot(w3_ref[...], h, preferred_element_type=jnp.float32) + b3_ref[...]
    )


@functools.partial(jax.jit, static_argnames=("tile_b",))
def mlp_forward(x, params, *, tile_b=8192):
    """x: (B, dim_in).  params: PyTorch-layout (W: (out, in), b: (out, 1))."""
    (w1, b1), (w2, b2), (w3, b3) = params
    B, dim_in = x.shape
    hidden = w1.shape[0]
    dim_out = w3.shape[0]

    # Lane-dense layout: put batch on the last (lane) axis, pad to the tile.
    xt = x.astype(jnp.float32).T                      # (dim_in, B)
    tile_b = min(tile_b, _round_up(B, 128))           # small batches -> one tile
    b_pad = _round_up(B, tile_b)
    if b_pad != B:
        xt = jnp.pad(xt, ((0, 0), (0, b_pad - B)))

    grid = (b_pad // tile_b,)

    cost = pl.CostEstimate(
        flops=2 * b_pad * (dim_in * hidden + hidden * hidden + hidden * dim_out),
        transcendentals=2 * b_pad * hidden,           # two SiLUs per row
        bytes_accessed=4
        * (
            b_pad * (dim_in + dim_out)
            + w1.size + w2.size + w3.size
            + b1.size + b2.size + b3.size
        ),
    )

    out_t = pl.pallas_call(
        mlp_kernel,
        out_shape=jax.ShapeDtypeStruct((dim_out, b_pad), jnp.float32),
        grid=grid,
        in_specs=[
            # x tile marches along the batch axis.
            pl.BlockSpec((dim_in, tile_b), lambda i: (0, i)),
            # Weights / biases: constant block index -> stay VMEM-resident.
            pl.BlockSpec((hidden, dim_in), lambda i: (0, 0)),
            pl.BlockSpec((hidden, 1), lambda i: (0, 0)),
            pl.BlockSpec((hidden, hidden), lambda i: (0, 0)),
            pl.BlockSpec((hidden, 1), lambda i: (0, 0)),
            pl.BlockSpec((dim_out, hidden), lambda i: (0, 0)),
            pl.BlockSpec((dim_out, 1), lambda i: (0, 0)),
        ],
        out_specs=pl.BlockSpec((dim_out, tile_b), lambda i: (0, i)),
        compiler_params=pltpu.CompilerParams(
            dimension_semantics=("parallel",),
            vmem_limit_bytes=64 * 1024 * 1024,
        ),
        cost_estimate=cost,
    )(xt, w1, b1, w2, b2, w3, b3)

    # Back to row-major (B, dim_out); drop batch padding.  Wrapper-side plumbing.
    return out_t[:, :B].T


def init_params(key, dim_in, dim_out, expansion_factor=2.0, depth=2):
    """Deterministic init mimicking nn.Linear; weights in (out, in) layout."""
    hidden = int(expansion_factor * dim_out)
    dims = [(dim_in, hidden)] + [(hidden, hidden)] * (depth - 1) + [(hidden, dim_out)]
    params = []
    for fan_in, fan_out in dims:
        key, kw, kb = jax.random.split(key, 3)
        bound = 1.0 / jnp.sqrt(fan_in)
        w = jax.random.uniform(kw, (fan_out, fan_in), jnp.float32, -bound, bound)
        # bias kept 2D (out, 1) so it broadcasts along the lane (batch) axis.
        b = jax.random.uniform(kb, (fan_out, 1), jnp.float32, -bound, bound)
        params.append((w, b))
    return params


def mlp_reference(x, params):
    """Plain-JAX reference (row-major) for the sanity check."""
    (w1, b1), (w2, b2), (w3, b3) = params
    h = x.astype(jnp.float32) @ w1.T + b1[:, 0]
    h = _silu(h)
    h = h @ w2.T + b2[:, 0]
    h = _silu(h)
    return h @ w3.T + b3[:, 0]


if __name__ == "__main__":
    key = jax.random.PRNGKey(0)
    batch, dim_in, dim_out = 8, 16, 8

    kx, kp = jax.random.split(key)
    x = jax.random.normal(kx, (batch, dim_in), dtype=jnp.float32)
    params = init_params(kp, dim_in, dim_out, expansion_factor=2.0, depth=2)

    out = mlp_forward(x, params)
    out = jax.block_until_ready(out)

    ref = mlp_reference(x, params)
    assert out.shape == (batch, dim_out)
    assert jnp.allclose(out, ref, atol=1e-5, rtol=1e-5)

    print("KERNEL_OK")
</pallas_src>

<mosaic_0001>
module attributes {stable_mosaic.version = 11 : i64} {
  func.func @mlp_kernel(%arg0: i32, %arg1: memref<16x128xf32, #tpu.memory_space<vmem>>, %arg2: memref<16x16xf32, #tpu.memory_space<vmem>>, %arg3: memref<16x1xf32, #tpu.memory_space<vmem>>, %arg4: memref<16x16xf32, #tpu.memory_space<vmem>>, %arg5: memref<16x1xf32, #tpu.memory_space<vmem>>, %arg6: memref<8x16xf32, #tpu.memory_space<vmem>>, %arg7: memref<8x1xf32, #tpu.memory_space<vmem>>, %arg8: memref<8x128xf32, #tpu.memory_space<vmem>>) attributes {dimension_semantics = [#tpu.dimension_semantics<parallel>], iteration_bounds = array<i64: 1>, scalar_prefetch = 0 : i64, scratch_operands = 0 : i64, tpu.core_type = #tpu.core_type<tc>, window_params = [{transform_indices = @transform_0, window_bounds = array<i64: 16, 128>}, {pipeline_mode = #tpu.pipeline_mode<synchronous>, transform_indices = @transform_1, window_bounds = array<i64: 16, 16>}, {pipeline_mode = #tpu.pipeline_mode<synchronous>, transform_indices = @transform_2, window_bounds = array<i64: 16, 1>}, {pipeline_mode = #tpu.pipeline_mode<synchronous>, transform_indices = @transform_3, window_bounds = array<i64: 16, 16>}, {pipeline_mode = #tpu.pipeline_mode<synchronous>, transform_indices = @transform_4, window_bounds = array<i64: 16, 1>}, {pipeline_mode = #tpu.pipeline_mode<synchronous>, transform_indices = @transform_5, window_bounds = array<i64: 8, 16>}, {pipeline_mode = #tpu.pipeline_mode<synchronous>, transform_indices = @transform_6, window_bounds = array<i64: 8, 1>}, {transform_indices = @transform_7, window_bounds = array<i64: 8, 128>}]} {
    %c0 = arith.constant 0 : index
    %c0_0 = arith.constant 0 : index
    %0 = vector.load %arg1[%c0, %c0_0] : memref<16x128xf32, #tpu.memory_space<vmem>>, vector<16x128xf32>
    %c0_1 = arith.constant 0 : index
    %c0_2 = arith.constant 0 : index
    %1 = vector.load %arg2[%c0_1, %c0_2] : memref<16x16xf32, #tpu.memory_space<vmem>>, vector<16x16xf32>
    %cst = arith.constant dense<0.000000e+00> : vector<16x128xf32>
    %2 = tpu.matmul %1, %0, %cst {dimension_numbers = #tpu.dot_dimension_numbers<[1], [0], [0], [1], [0, 0, 1, 1], [], []>} : vector<16x16xf32>, vector<16x128xf32>, vector<16x128xf32> -> vector<16x128xf32>
    %c0_3 = arith.constant 0 : index
    %c0_4 = arith.constant 0 : index
    %3 = vector.load %arg3[%c0_3, %c0_4] : memref<16x1xf32, #tpu.memory_space<vmem>>, vector<16x1xf32>
    %4 = vector.broadcast %3 : vector<16x1xf32> to vector<16x128xf32>
    %5 = arith.addf %2, %4 : vector<16x128xf32>
    %6 = arith.negf %5 : vector<16x128xf32>
    %7 = math.exp %6 : vector<16x128xf32>
    %cst_5 = arith.constant 1.000000e+00 : f32
    %8 = vector.broadcast %cst_5 : f32 to vector<16x128xf32>
    %9 = arith.addf %8, %7 : vector<16x128xf32>
    %10 = arith.divf %8, %9 : vector<16x128xf32>
    %11 = arith.mulf %5, %10 : vector<16x128xf32>
    %c0_6 = arith.constant 0 : index
    %c0_7 = arith.constant 0 : index
    %12 = vector.load %arg4[%c0_6, %c0_7] : memref<16x16xf32, #tpu.memory_space<vmem>>, vector<16x16xf32>
    %cst_8 = arith.constant dense<0.000000e+00> : vector<16x128xf32>
    %13 = tpu.matmul %12, %11, %cst_8 {dimension_numbers = #tpu.dot_dimension_numbers<[1], [0], [0], [1], [0, 0, 1, 1], [], []>} : vector<16x16xf32>, vector<16x128xf32>, vector<16x128xf32> -> vector<16x128xf32>
    %c0_9 = arith.constant 0 : index
    %c0_10 = arith.constant 0 : index
    %14 = vector.load %arg5[%c0_9, %c0_10] : memref<16x1xf32, #tpu.memory_space<vmem>>, vector<16x1xf32>
    %15 = vector.broadcast %14 : vector<16x1xf32> to vector<16x128xf32>
    %16 = arith.addf %13, %15 : vector<16x128xf32>
    %17 = arith.negf %16 : vector<16x128xf32>
    %18 = math.exp %17 : vector<16x128xf32>
    %cst_11 = arith.constant 1.000000e+00 : f32
    %19 = vector.broadcast %cst_11 : f32 to vector<16x128xf32>
    %20 = arith.addf %19, %18 : vector<16x128xf32>
    %21 = arith.divf %19, %20 : vector<16x128xf32>
    %22 = arith.mulf %16, %21 : vector<16x128xf32>
    %c0_12 = arith.constant 0 : index
    %c0_13 = arith.constant 0 : index
    %23 = vector.load %arg6[%c0_12, %c0_13] : memref<8x16xf32, #tpu.memory_space<vmem>>, vector<8x16xf32>
    %cst_14 = arith.constant dense<0.000000e+00> : vector<8x128xf32>
    %24 = tpu.matmul %23, %22, %cst_14 {dimension_numbers = #tpu.dot_dimension_numbers<[1], [0], [0], [1], [0, 0, 1, 1], [], []>} : vector<8x16xf32>, vector<16x128xf32>, vector<8x128xf32> -> vector<8x128xf32>
    %c0_15 = arith.constant 0 : index
    %c0_16 = arith.constant 0 : index
    %25 = vector.load %arg7[%c0_15, %c0_16] : memref<8x1xf32, #tpu.memory_space<vmem>>, vector<8x1xf32>
    %26 = vector.broadcast %25 : vector<8x1xf32> to vector<8x128xf32>
    %27 = arith.addf %24, %26 : vector<8x128xf32>
    %c0_17 = arith.constant 0 : index
    %c0_18 = arith.constant 0 : index
    %28 = vector.load %arg8[%c0_17, %c0_18] : memref<8x128xf32, #tpu.memory_space<vmem>>, vector<8x128xf32>
    tpu.vector_store %arg8[%c0_17, %c0_18], %27 {strides = array<i32>} : memref<8x128xf32, #tpu.memory_space<vmem>>, vector<8x128xf32>,
    return
  }
  func.func @transform_0(%arg0: i32) -> (i32, i32) {
    %c0_i32 = arith.constant 0 : i32
    %c0_i32_0 = arith.constant 0 : i32
    return %c0_i32, %arg0 : i32, i32
  }
  func.func @transform_1(%arg0: i32) -> (i32, i32) {
    %c0_i32 = arith.constant 0 : i32
    %c0_i32_0 = arith.constant 0 : i32
    %c0_i32_1 = arith.constant 0 : i32
    return %c0_i32, %c0_i32_0 : i32, i32
  }
  func.func @transform_2(%arg0: i32) -> (i32, i32) {
    %c0_i32 = arith.constant 0 : i32
    %c0_i32_0 = arith.constant 0 : i32
    %c0_i32_1 = arith.constant 0 : i32
    return %c0_i32, %c0_i32_0 : i32, i32
  }
  func.func @transform_3(%arg0: i32) -> (i32, i32) {
    %c0_i32 = arith.constant 0 : i32
    %c0_i32_0 = arith.constant 0 : i32
    %c0_i32_1 = arith.constant 0 : i32
    return %c0_i32, %c0_i32_0 : i32, i32
  }
  func.func @transform_4(%arg0: i32) -> (i32, i32) {
    %c0_i32 = arith.constant 0 : i32
    %c0_i32_0 = arith.constant 0 : i32
    %c0_i32_1 = arith.constant 0 : i32
    return %c0_i32, %c0_i32_0 : i32, i32
  }
  func.func @transform_5(%arg0: i32) -> (i32, i32) {
    %c0_i32 = arith.constant 0 : i32
    %c0_i32_0 = arith.constant 0 : i32
    %c0_i32_1 = arith.constant 0 : i32
    return %c0_i32, %c0_i32_0 : i32, i32
  }
  func.func @transform_6(%arg0: i32) -> (i32, i32) {
    %c0_i32 = arith.constant 0 : i32
    %c0_i32_0 = arith.constant 0 : i32
    %c0_i32_1 = arith.constant 0 : i32
    return %c0_i32, %c0_i32_0 : i32, i32
  }
  func.func @transform_7(%arg0: i32) -> (i32, i32) {
    %c0_i32 = arith.constant 0 : i32
    %c0_i32_0 = arith.constant 0 : i32
    return %c0_i32, %arg0 : i32, i32
  }
}

</mosaic_0001>

<bundles_post_ra>
// kernel: mlp_forward.1
= control target key start
LH: loop header
LB: loop body
LE: loop exit
PB: predicated region body
PF: predicated region fallthrough
CT: control target
= control target key end

     0   :  { %12 = vsyncpa [#allocation3], 0  ;;  %s899_s0 = inlined_call_operand.hbm [shape: f32[16,128], index: 0, kind: input, shape index: {}]   ;;  %s900_s1 = inlined_call_operand.hbm [shape: f32[16,16], index: 1, kind: input, shape index: {}]   ;;  %s901_s2 = inlined_call_operand.hbm [shape: f32[16,1], index: 2, kind: input, shape index: {}]   ;;  %s902_s3 = inlined_call_operand.hbm [shape: f32[16,16], index: 3, kind: input, shape index: {}]   ;;  %s903_s4 = inlined_call_operand.hbm [shape: f32[16,1], index: 4, kind: input, shape index: {}]   ;;  %s904_s5 = inlined_call_operand.hbm [shape: f32[8,16], index: 5, kind: input, shape index: {}]   ;;  %s905_s6 = inlined_call_operand.hbm [shape: f32[8,1], index: 6, kind: input, shape index: {}]   ;;  %s906_s7 = inlined_call_operand.hbm [shape: f32[8,128], index: 7, kind: output, shape index: {}]  }
   0x1   :  { %13 = vsyncpa [#allocation6], 0 }
   0x2   :  { %14 = vsyncpa [#allocation9], 0 }
   0x3   :  { %15 = vsyncpa [#allocation12], 0 }
   0x4   :  { %16 = vsyncpa [#allocation4], 0  ;;  %s708_s24 = smov [#allocation5]   ;;  %s709_s26 = smov [#allocation8]  }
   0x5   :  { %s34_s25 = sshll.u32 %s708_s24, 4  ;;  %s58_s27 = sshll.u32 %s709_s26, 4  ;;  %s35_s25 = int_to_ptr.vmem [resolvable:$true] %s34_s25  ;;  %s762_s27 = int_to_ptr.vmem [resolvable:$true] %s58_s27 }
   0x6   :  { %s522_s30 = scalar_lea.hbm %s900_s1, 256 }
   0x7   :  { %p523_p0 = scmp.ne.s32.totalorder %s900_s1, %s522_s30  ;;  %p526_p1 = scmp.lt.u32.totalorder %s522_s30, %s900_s1 }
   0x9   :  { %p528_p2 = pnand %p526_p1, %p523_p0 }
   0xb   :  { %531 = shalt.err (!%p528_p2)
}
   0xc   :  { %s532_s12 = scalar_lea.vmem %s35_s25, 256  ;;  %p537_p4 = scmp.lt.s32.totalorder %s35_s25, %s35_s25 }
   0xd   :  { %p533_p3 = scmp.ne.s32.totalorder %s35_s25, %s532_s12  ;;  %p538_p5 = scmp.lt.s32.totalorder %s532_s12, %s532_s12 }
   0xf   :  { %p539_p6 = por %p538_p5, %p537_p4 }
  0x11   :  { %p540_p7 = pnand %p539_p6, %p533_p3 }
  0x13   :  { %543 = shalt.err (!%p540_p7)
}
  0x14   :  { %s710_s13 = smov 128   ;;  %s711_s14 = smov 8  }
  0x15   :  { %40 = dma.hbm_to_vmem [thread:$0]  %s900_s1, 256, %s35_s25, [#allocation6], %s710_s13, %s710_s13, %s711_s14  }
  0x16   :  { %s544_s19 = scalar_lea.hbm %s902_s3, 256 }
  0x17   :  { %p545_p8 = scmp.ne.s32.totalorder %s902_s3, %s544_s19  ;;  %p548_p9 = scmp.lt.u32.totalorder %s544_s19, %s902_s3 }
  0x19   :  { %p550_p10 = pnand %p548_p9, %p545_p8 }
  0x1b   :  { %553 = shalt.err (!%p550_p10)
}
  0x1c   :  { %s554_s24 = scalar_lea.vmem %s762_s27, 256  ;;  %p559_p12 = scmp.lt.s32.totalorder %s762_s27, %s762_s27 }
  0x1d   :  { %p555_p11 = scmp.ne.s32.totalorder %s762_s27, %s554_s24  ;;  %p560_p13 = scmp.lt.s32.totalorder %s554_s24, %s554_s24 }
  0x1f   :  { %p561_p0 = por %p560_p13, %p559_p12 }
  0x21   :  { %p562_p1 = pnand %p561_p0, %p555_p11 }
  0x23   :  { %565 = shalt.err (!%p562_p1)
}
  0x24   :  { %64 = dma.hbm_to_vmem [thread:$0]  %s902_s3, 256, %s762_s27, [#allocation9], %s710_s13, %s710_s13, %s711_s14  }
  0x25   :  { %s712_s26 = smov [#allocation11]   ;;  %s713_s29 = smov [#allocation2]  }
  0x26   :  { %s83_s28 = sshll.u32 %s712_s26, 4  ;;  %s22_s30 = sshll.u32 %s713_s29, 4  ;;  %s84_s28 = int_to_ptr.vmem [resolvable:$true] %s83_s28  ;;  %s799_s30 = int_to_ptr.vmem [resolvable:$true] %s22_s30 }
  0x27   :  { %s566_s10 = scalar_lea.hbm %s904_s5, 128 }
  0x28   :  { %p567_p2 = scmp.ne.s32.totalorder %s904_s5, %s566_s10  ;;  %p570_p3 = scmp.lt.u32.totalorder %s566_s10, %s904_s5 }
  0x2a   :  { %p572_p4 = pnand %p570_p3, %p567_p2 }
  0x2c   :  { %575 = shalt.err (!%p572_p4)
}
  0x2d   :  { %s576_s3 = scalar_lea.vmem %s84_s28, 128  ;;  %p581_p6 = scmp.lt.s32.totalorder %s84_s28, %s84_s28 }
  0x2e   :  { %p577_p5 = scmp.ne.s32.totalorder %s84_s28, %s576_s3  ;;  %p582_p7 = scmp.lt.s32.totalorder %s576_s3, %s576_s3 }
  0x30   :  { %p583_p8 = por %p582_p7, %p581_p6 }
  0x32   :  { %p584_p9 = pnand %p583_p8, %p577_p5 }
  0x34   :  { %587 = shalt.err (!%p584_p9)
}
  0x35   :  { %86 = dma.hbm_to_vmem [thread:$0]  %s904_s5, 128, %s84_s28, [#allocation12]  }
  0x36   :  { %s588_s20 = scalar_lea.hbm %s899_s0, 256 }
  0x37   :  { %p589_p10 = scmp.ne.s32.totalorder %s899_s0, %s588_s20  ;;  %p592_p11 = scmp.lt.u32.totalorder %s588_s20, %s899_s0 }
  0x39   :  { %p594_p12 = pnand %p592_p11, %p589_p10 }
  0x3b   :  { %597 = shalt.err (!%p594_p12)
}
  0x3c   :  { %s598_s1 = scalar_lea.vmem %s799_s30, 256  ;;  %p603_p0 = scmp.lt.s32.totalorder %s799_s30, %s799_s30 }
  0x3d   :  { %p599_p13 = scmp.ne.s32.totalorder %s799_s30, %s598_s1  ;;  %p604_p1 = scmp.lt.s32.totalorder %s598_s1, %s598_s1 }
  0x3f   :  { %p605_p2 = por %p604_p1, %p603_p0 }
  0x41   :  { %p606_p3 = pnand %p605_p2, %p599_p13 }
  0x43   :  { %609 = shalt.err (!%p606_p3)
}
  0x44   :  { %28 = dma.hbm_to_vmem [thread:$0]  %s899_s0, 256, %s799_s30, [#allocation3], %s710_s13, %s710_s13, %s711_s14  }
  0x45   :  { %s714_s26 = smov [#allocation7]   ;;  %s715_s29 = smov [#allocation10]  }
  0x46   :  { %s46_s28 = sshll.u32 %s714_s26, 4  ;;  %s70_s8 = sshll.u32 %s715_s29, 4  ;;  %s47_s28 = int_to_ptr.vmem [resolvable:$true] %s46_s28  ;;  %s833_s8 = int_to_ptr.vmem [resolvable:$true] %s70_s8 }
  0x47   :  { %s610_s11 = scalar_lea.hbm %s901_s2, 256 }
  0x48   :  { %p611_p4 = scmp.ne.s32.totalorder %s901_s2, %s610_s11  ;;  %p614_p5 = scmp.lt.u32.totalorder %s610_s11, %s901_s2 }
  0x4a   :  { %p616_p6 = pnand %p614_p5, %p611_p4 }
  0x4c   :  { %619 = shalt.err (!%p616_p6)
}
  0x4d   :  { %s620_s0 = scalar_lea.vmem %s47_s28, 256  ;;  %p625_p8 = scmp.lt.s32.totalorder %s47_s28, %s47_s28 }
  0x4e   :  { %p621_p7 = scmp.ne.s32.totalorder %s47_s28, %s620_s0  ;;  %p626_p9 = scmp.lt.s32.totalorder %s620_s0, %s620_s0 }
  0x50   :  { %p627_p10 = por %p626_p9, %p625_p8 }
  0x52   :  { %p628_p11 = pnand %p627_p10, %p621_p7 }
  0x54   :  { %631 = shalt.err (!%p628_p11)
}
  0x55   :  { %52 = dma.hbm_to_vmem [thread:$0]  %s901_s2, 256, %s47_s28, [#allocation6], %s710_s13, %s710_s13, %s711_s14  }
  0x56   :  { %s632_s19 = scalar_lea.hbm %s903_s4, 256 }
  0x57   :  { %p633_p12 = scmp.ne.s32.totalorder %s903_s4, %s632_s19  ;;  %p636_p13 = scmp.lt.u32.totalorder %s632_s19, %s903_s4 }
  0x59   :  { %p638_p0 = pnand %p636_p13, %p633_p12 }
  0x5b   :  { %641 = shalt.err (!%p638_p0)
}
  0x5c   :  { %s642_s24 = scalar_lea.vmem %s833_s8, 256  ;;  %p647_p2 = scmp.lt.s32.totalorder %s833_s8, %s833_s8 }
  0x5d   :  { %p643_p1 = scmp.ne.s32.totalorder %s833_s8, %s642_s24  ;;  %p648_p3 = scmp.lt.s32.totalorder %s642_s24, %s642_s24 }
  0x5f   :  { %p649_p4 = por %p648_p3, %p647_p2 }
  0x61   :  { %p650_p5 = pnand %p649_p4, %p643_p1 }
  0x63   :  { %653 = shalt.err (!%p650_p5)
}
  0x64   :  { %76 = dma.hbm_to_vmem [thread:$0]  %s903_s4, 256, %s833_s8, [#allocation9], %s710_s13, %s710_s13, %s711_s14  }
  0x65   :  { %s716_s5 = smov [#allocation13]   ;;  %s654_s29 = scalar_lea.hbm %s905_s6, 128 }
  0x66   :  { %s93_s25 = sshll.u32 %s716_s5, 4  ;;  %p655_p6 = scmp.ne.s32.totalorder %s905_s6, %s654_s29  ;;  %s94_s25 = int_to_ptr.vmem [resolvable:$true] %s93_s25 }
  0x67   :  { %p658_p7 = scmp.lt.u32.totalorder %s654_s29, %s905_s6 }
  0x69   :  { %p660_p8 = pnand %p658_p7, %p655_p6 }
  0x6b   :  { %663 = shalt.err (!%p660_p8)
}
  0x6c   :  { %s664_s15 = scalar_lea.vmem %s94_s25, 128  ;;  %p669_p10 = scmp.lt.s32.totalorder %s94_s25, %s94_s25 }
  0x6d   :  { %p665_p9 = scmp.ne.s32.totalorder %s94_s25, %s664_s15  ;;  %p670_p11 = scmp.lt.s32.totalorder %s664_s15, %s664_s15 }
  0x6f   :  { %p671_p12 = por %p670_p11, %p669_p10 }
  0x71   :  { %p672_p13 = pnand %p671_p12, %p665_p9 }
  0x73   :  { %675 = shalt.err (!%p672_p13)
}
  0x74   :  { %96 = dma.hbm_to_vmem [thread:$0]  %s905_s6, 128, %s94_s25, [#allocation12]  }
  0x75   :  { %698 = dma.done.wait [#allocation3], 256  }
  0x76   :  { %699 = vsyncadd [#allocation3], 4294967040 }
  0x77   :  { %700 = dma.done.wait [#allocation6], 512  }
  0x78   :  { %701 = vsyncadd [#allocation6], 4294966784 }
  0x79   :  { %702 = dma.done.wait [#allocation9], 512  }
  0x7a   :  { %703 = vsyncadd [#allocation9], 4294966784 }
  0x7b   :  { %704 = dma.done.wait [#allocation12], 256  }
  0x7c   :  { %705 = vsyncadd [#allocation12], 4294967040  ;;  %v717_v0 = vmov 0   ;;  %vm134_vm0 = vcmask 130048   ;;  %v118_v1 = vld [vmem:[#allocation2] sm:$0xff]  ;;  %v119_v2 = vld [vmem:[#allocation2 + $0x8] sm:$0xff] }
  0x7d   :  { %504 = vset.pattern.permute.xlu0 %v717_v0  ;;  %505 = vset.pattern.permute.xlu1 %v717_v0  ;;  %v120_v3 = vld [vmem:[#allocation5] sm:$0xff]  ;;  %v479_v4 = vpack.c.bf16 %v119_v2, %v118_v1  ;;  %v122_v5 = vld [vmem:[#allocation7] sm:$0xff]  ;;  %v123_v6 = vld [vmem:[#allocation7 + $0x8] sm:$0xff]  ;;  %v718_v30 = vmov 0.0|0.0   ;;  %vm719_vm1 = vmmov 0   ;;  %v720_v31 = vmov 0.0  }
  0x7e   :  { %462 = vmatprep.mubr.msk.f32.mxu0 %vm134_vm0, %v120_v3  ;;  %126 = vperm.xlu0 %504, %v122_v5   ;;  %v121_v7 = vld [vmem:[#allocation5 + $0x8] sm:$0xff]  ;;  %v230_v9 = vld [vmem:[#allocation8] sm:$0xff]  ;;  %v232_v10 = vld [vmem:[#allocation10] sm:$0xff]  ;;  %s721_s6 = smov [#allocation14]  }
  0x7f   :  { %480 = vmatprep.subr.bf16.mxu0 %v479_v4  ;;  %v340_v8 = vld [vmem:[#allocation13] sm:$0xff]  ;;  %469 = vmatprep.mubr.msk.f32.mxu1 %vm134_vm0, %v230_v9  ;;  %v233_v11 = vld [vmem:[#allocation10 + $0x8] sm:$0xff]  ;;  %v339_v49 = vld [vmem:[#allocation11] sm:$0xff]  ;;  %s426_s14 = sshll.u32 %s721_s6, 4  ;;  %s427_s14 = int_to_ptr.vmem [resolvable:$true] %s426_s14 }
  0x80   :  { %482 = vmatpush3.bf16.msra.mxu0 %v479_v4  ;;  %236 = vperm.xlu1 %505, %v232_v10   ;;  %v231_v29 = vld [vmem:[#allocation8 + $0x8] sm:$0xff]  ;;  %s676_s8 = scalar_lea.vmem %s427_s14, 128  ;;  %p681_p1 = scmp.lt.s32.totalorder %s427_s14, %s427_s14 }
  0x81   :  { %487 = vmatprep.subr.bf16.mxu0 %v718_v30  ;;  %p677_p0 = scmp.ne.s32.totalorder %s427_s14, %s676_s8  ;;  %p682_p2 = scmp.lt.s32.totalorder %s676_s8, %s676_s8 }
  0x82   :  { %131 = vperm.xlu0 %504, %v123_v6  }
  0x83   :  { %463 = vmatmul.mubr.msk.f32.vlgmr.msra.gmra.mrb[0].mxu0 %vm134_vm0, %v121_v7  ;;  %p683_p3 = por %p682_p2, %p681_p1 }
  0x84   :  { %241 = vperm.xlu1 %505, %v233_v11   ;;  %476 = vmatprep.mubr.msk.f32.mxu0 %vm719_vm1, %v720_v31 }
  0x85   :  { %p684_p4 = pnand %p683_p3, %p677_p0 }
  0x86   :  { %343 = vperm.xlu0 %504, %v340_v8  }
  0xfd   :  { %v127_v12 = vpop.permute.xlu0 %126 }
  0xff   :  { %v237_v32 = vpop.permute.xlu1 %236 }
 0x101   :  { %v132_v13 = vpop.permute.xlu0 %131 }
 0x103   :  { %v242_v33 = vpop.permute.xlu1 %241 }
 0x105   :  { %v344_v50 = vpop.permute.xlu0 %343 }
 0x156   :  { %v464_v14 = vpop.f32.mrb[0].mxu0 }
 0x157   :  { %v213_v15 = vadd.f32 %v464_v14, %v132_v13  ;;  %v207_v16 = vpop.f32.mrb[1].mxu0 }
 0x158   :  { %v208_v17 = vadd.f32 %v207_v16, %v127_v12 }
 0x159   :  { %v441_v18 = vmul.f32 -1.442695, %v213_v15 }
 0x15a   :  { %v440_v19 = vmul.f32 -1.442695, %v208_v17 }
 0x15b   :  { %506 = vpow2.f32 %v441_v18 }
 0x15c   :  { %508 = vpow2.f32 %v440_v19 }
 0x165   :  { %v507_v20 = vpop.eup %506 }
 0x166   :  { %v509_v21 = vpop.eup %508  ;;  %v223_v22 = vadd.f32 1.0, %v507_v20 }
 0x167   :  { %v222_v23 = vadd.f32 1.0, %v509_v21 }
 0x168   :  { %510 = vrcp.f32 %v223_v22 }
 0x169   :  { %512 = vrcp.f32 %v222_v23 }
 0x172   :  { %v511_v24 = vpop.eup %510 }
 0x173   :  { %v513_v25 = vpop.eup %512  ;;  %v229_v26 = vmul.f32 %v511_v24, %v213_v15 }
 0x174   :  { %v228_v27 = vmul.f32 %v513_v25, %v208_v17 }
 0x176   :  { %v483_v28 = vpack.c.bf16 %v229_v26, %v228_v27 }
 0x178   :  { %484 = vmatprep.subr.bf16.mxu1 %v483_v28 }
 0x179   :  { %486 = vmatpush3.bf16.msra.mxu1 %v483_v28 }
 0x17c   :  { %470 = vmatmul.mubr.msk.f32.vlgmr.msra.gmra.mrb[0].mxu1 %vm134_vm0, %v231_v29 }
 0x24f   :  { %v471_v34 = vpop.f32.mrb[0].mxu1 }
 0x250   :  { %v322_v35 = vadd.f32 %v471_v34, %v242_v33  ;;  %v316_v36 = vpop.f32.mrb[1].mxu1 }
 0x251   :  { %v317_v37 = vadd.f32 %v316_v36, %v237_v32 }
 0x252   :  { %v445_v38 = vmul.f32 -1.442695, %v322_v35 }
 0x253   :  { %v444_v39 = vmul.f32 -1.442695, %v317_v37 }
 0x254   :  { %514 = vpow2.f32 %v445_v38 }
 0x255   :  { %516 = vpow2.f32 %v444_v39 }
 0x25e   :  { %v515_v40 = vpop.eup %514 }
 0x25f   :  { %v517_v41 = vpop.eup %516  ;;  %v332_v42 = vadd.f32 1.0, %v515_v40 }
 0x260   :  { %v331_v43 = vadd.f32 1.0, %v517_v41 }
 0x261   :  { %518 = vrcp.f32 %v332_v42 }
 0x262   :  { %520 = vrcp.f32 %v331_v43 }
 0x26b   :  { %v519_v44 = vpop.eup %518 }
 0x26c   :  { %v521_v45 = vpop.eup %520  ;;  %v338_v46 = vmul.f32 %v519_v44, %v322_v35 }
 0x26d   :  { %v337_v47 = vmul.f32 %v521_v45, %v317_v37 }
 0x26f   :  { %v488_v48 = vpack.c.bf16 %v338_v46, %v337_v47 }
 0x271   :  { %489 = vmatpush3.bf16.msra.mxu0 %v488_v48 }
 0x274   :  { %477 = vmatmul.mubr.msk.f32.vlgmr.msra.gmra.mrb[2].mxu0 %vm134_vm0, %v339_v49 }
 0x347   :  { %v415_v51 = vpop.f32.mrb[2].mxu0 }
 0x348   :  { %v416_v52 = vadd.f32 %v415_v51, %v344_v50  ;;  %v478_v53 = vpop.f32.mrb[3].mxu0 }
 0x34a   :  { %419 = vst [vmem:[#allocation14] sm:$0xff] %v416_v52 }
 0x34b   :  { %687 = shalt.err (!%p684_p4)
}
 0x34c   :  { %s688_s0 = scalar_lea.hbm %s906_s7, 128 }
 0x34d   :  { %p689_p5 = scmp.ne.s32.totalorder %s906_s7, %s688_s0  ;;  %p692_p6 = scmp.lt.u32.totalorder %s688_s0, %s906_s7 }
 0x34f   :  { %p694_p7 = pnand %p692_p6, %p689_p5 }
 0x351   :  { %697 = shalt.err (!%p694_p7)
}
 0x352   :  { %429 = dma.vmem_to_hbm [thread:$0]  %s427_s14, 128, %s906_s7, [#allocation4]  }
 0x353   :  { %706 = dma.done.wait [#allocation4], 128  }
 0x354   :  { %707 = vsyncadd [#allocation4], 4294967168 }
 0x355   :  { %433 = vsyncpa [#allocation3], 1 }
 0x356   :  { %434 = vsyncpa [#allocation6], 1 }
 0x357   :  { %435 = vsyncpa [#allocation9], 1 }
 0x358   :  { %436 = vsyncpa [#allocation12], 1 }
 0x359   :  { %437 = vsyncpa [#allocation4], 1 }

</bundles_post_ra>
